<compile_context>
chip_gen: v7x
topology: tpu7x:2x2x1
jax: 0.10.0
libtpu: 0.0.40
codegen_flags: <defaults>
</compile_context>

<pallas_src>
import jax
import jax.numpy as jnp
from jax.experimental import pallas as pl
from jax.experimental.pallas import tpu as pltpu

INPUT_SIZE = 4
H1 = 64
H2 = 32
OUT = 1

DEFAULT_BLOCK_B = 8192  # rows per grid step; ~13 MiB live VMEM at f32


def _round_up(n, m):
    return ((n + m - 1) // m) * m


# Contract dim 1 of both operands: lhs (out, in) x rhs (batch, in) -> (out, batch).
# Same "NT" pattern as splash attention's q @ k^T, so Mosaic's matmul lowering
# handles the transposed rhs natively -- no explicit (TB, 4) -> (4, TB) transpose
# in the kernel and no host-side x.T pass.
_NT_DIMS = (((1,), (1,)), ((), ()))


def mlp_kernel(x_ref, w1_ref, b1_ref, w2_ref, b2_ref, w3_ref, b3_ref, o_ref):
    x = x_ref[...]                                              # (TB, 4) batch-major

    # Layer 1: (64, 4) . (TB, 4)^T -> (64, TB): batch lands on the lane axis.
    h1 = jax.lax.dot_general(w1_ref[...], x, _NT_DIMS,
                             preferred_element_type=jnp.float32)
    h1 = jnp.maximum(h1 + b1_ref[...], 0.0)                     # bias + ReLU (VPU)

    # Layer 2: (32, 64) . (64, TB) -> (32, TB)
    h2 = jnp.dot(w2_ref[...], h1, preferred_element_type=jnp.float32)
    h2 = jnp.maximum(h2 + b2_ref[...], 0.0)

    # Layer 3: (1, 32) . (32, TB) -> (1, TB), scalar bias read from SMEM.
    logits = jnp.dot(w3_ref[...], h2, preferred_element_type=jnp.float32)
    logits = logits + b3_ref[0, 0]

    # Sigmoid on the EUP via tanh: exact and saturating (no exp overflow).
    o_ref[...] = 0.5 * (jnp.tanh(0.5 * logits) + 1.0)           # lane-dense (1, TB) store


def _pick_tile(batch, block_b):
    """Rows per grid step (output lane tile)."""
    if batch <= 128:
        # One exact full-extent block: no padding, no ragged edge.
        return batch
    tb = min(block_b, _round_up(batch, 128))
    # Keep >= 2 grid steps so the "parallel" batch axis can shard across both
    # TensorCores on v7x (no effect on single-TC v5e/v6e).
    half = max(128, _round_up(pl.cdiv(batch, 2), 128))
    return min(tb, half)


def password_strength_forward(x, params, *, block_b=DEFAULT_BLOCK_B):
    """x: (B, INPUT_SIZE) f32.  Returns (B, 1) f32 sigmoid outputs."""
    w1, b1, w2, b2, w3, b3 = params
    batch = x.shape[0]

    tb = _pick_tile(batch, block_b)
    # Ragged final block (when tb does not divide B) is handled by Pallas:
    # out-of-bounds rows are padded garbage on read and masked on writeback,
    # and each output lane depends only on its own row, so results are exact.
    grid = (pl.cdiv(batch, tb),)

    weight_bytes = 4 * (H1 * INPUT_SIZE + H1 + H2 * H1 + H2 + OUT * H2 + OUT)
    cost = pl.CostEstimate(
        flops=2 * batch * (INPUT_SIZE * H1 + H1 * H2 + H2 * OUT),
        transcendentals=batch,                              # one tanh per row
        bytes_accessed=batch * 4 * (INPUT_SIZE + OUT) + weight_bytes,
    )

    out_t = pl.pallas_call(
        mlp_kernel,
        out_shape=jax.ShapeDtypeStruct((OUT, batch), jnp.float32),
        grid=grid,
        in_specs=[
            # x streams through the pipeline, one (tb, 4) batch-major slab per step.
            pl.BlockSpec((tb, INPUT_SIZE), lambda i: (i, 0)),
            # Weights / biases: full blocks, resident across all grid steps.
            pl.BlockSpec((H1, INPUT_SIZE), lambda i: (0, 0)),   # w1 (64, 4)
            pl.BlockSpec((H1, 1), lambda i: (0, 0)),            # b1 (64, 1)
            pl.BlockSpec((H2, H1), lambda i: (0, 0)),           # w2 (32, 64)
            pl.BlockSpec((H2, 1), lambda i: (0, 0)),            # b2 (32, 1)
            pl.BlockSpec((OUT, H2), lambda i: (0, 0)),          # w3 (1, 32)
            # Scalar bias lives in SMEM (avoids a padded (1, 1) VMEM tile).
            pl.BlockSpec(memory_space=pltpu.MemorySpace.SMEM),  # b3 (1, 1)
        ],
        out_specs=pl.BlockSpec((OUT, tb), lambda i: (0, i)),    # lane-dense output
        compiler_params=pltpu.CompilerParams(
            dimension_semantics=("parallel",),
            # ~1.6 KB/row live footprint (lane-padded x double-buffer + h1/h2 +
            # out double-buffer) => ~13 MiB at tb=8192; 32 MiB covers it with
            # headroom on all of v5e/v6e/v7x (and raises v5e's 16 MiB default).
            vmem_limit_bytes=32 * 1024 * 1024,
        ),
        cost_estimate=cost,
    )(x, w1, b1, w2, b2, w3, b3)

    # (1, B) -> (B, 1): dim-1 transpose is a free relabel of the same layout.
    return out_t.T


def init_params(key):
    # Deterministic init mimicking nn.Linear defaults (uniform +/- 1/sqrt(fan_in)).
    # Weights kept in the torch (out_features, in_features) layout, which is
    # exactly what the kernel consumes; biases are (out_features, 1).
    keys = jax.random.split(key, 6)

    def linear(kw, kb, fan_in, fan_out):
        bound = 1.0 / jnp.sqrt(fan_in)
        w = jax.random.uniform(kw, (fan_out, fan_in), jnp.float32, -bound, bound)
        b = jax.random.uniform(kb, (fan_out, 1), jnp.float32, -bound, bound)
        return w, b

    w1, b1 = linear(keys[0], keys[1], INPUT_SIZE, H1)
    w2, b2 = linear(keys[2], keys[3], H1, H2)
    w3, b3 = linear(keys[4], keys[5], H2, OUT)
    return (w1, b1, w2, b2, w3, b3)


def _reference(x, params):
    w1, b1, w2, b2, w3, b3 = params
    h1 = jnp.maximum(x @ w1.T + b1.T, 0.0)
    h2 = jnp.maximum(h1 @ w2.T + b2.T, 0.0)
    return jax.nn.sigmoid(h2 @ w3.T + b3.T)


if __name__ == "__main__":
    key = jax.random.PRNGKey(0)
    k_params, k_small, k_big = jax.random.split(key, 3)
    params = init_params(k_params)

    # Small batch: exercises the single full-extent block path.
    batch = 8
    x_small = jax.random.normal(k_small, (batch, INPUT_SIZE), dtype=jnp.float32)
    out_small = jax.block_until_ready(password_strength_forward(x_small, params))
    ref_small = _reference(x_small, params)
    assert out_small.shape == (batch, OUT)
    assert jnp.allclose(out_small, ref_small, atol=1e-3, rtol=1e-3), (
        f"max abs err = {jnp.max(jnp.abs(out_small - ref_small))}"
    )

    # Larger batch: exercises the multi-step (>=2 grid steps) tiled path.
    batch_big = 512
    x_big = jax.random.normal(k_big, (batch_big, INPUT_SIZE), dtype=jnp.float32)
    out_big = jax.block_until_ready(password_strength_forward(x_big, params))
    ref_big = _reference(x_big, params)
    assert out_big.shape == (batch_big, OUT)
    assert jnp.allclose(out_big, ref_big, atol=1e-3, rtol=1e-3), (
        f"max abs err = {jnp.max(jnp.abs(out_big - ref_big))}"
    )

    print("KERNEL_OK")
</pallas_src>

<mosaic_0001>
module attributes {stable_mosaic.version = 11 : i64} {
  func.func @mlp_kernel(%arg0: i32, %arg1: memref<8x4xf32, #tpu.memory_space<vmem>>, %arg2: memref<64x4xf32, #tpu.memory_space<vmem>>, %arg3: memref<64x1xf32, #tpu.memory_space<vmem>>, %arg4: memref<32x64xf32, #tpu.memory_space<vmem>>, %arg5: memref<32x1xf32, #tpu.memory_space<vmem>>, %arg6: memref<1x32xf32, #tpu.memory_space<vmem>>, %arg7: memref<1x1xf32, #tpu.memory_space<smem>>, %arg8: memref<1x8xf32, #tpu.memory_space<vmem>>) attributes {dimension_semantics = [#tpu.dimension_semantics<parallel>], iteration_bounds = array<i64: 1>, scalar_prefetch = 0 : i64, scratch_operands = 0 : i64, tpu.core_type = #tpu.core_type<tc>, window_params = [{transform_indices = @transform_0, window_bounds = array<i64: 8, 4>}, {pipeline_mode = #tpu.pipeline_mode<synchronous>, transform_indices = @transform_1, window_bounds = array<i64: 64, 4>}, {pipeline_mode = #tpu.pipeline_mode<synchronous>, transform_indices = @transform_2, window_bounds = array<i64: 64, 1>}, {pipeline_mode = #tpu.pipeline_mode<synchronous>, transform_indices = @transform_3, window_bounds = array<i64: 32, 64>}, {pipeline_mode = #tpu.pipeline_mode<synchronous>, transform_indices = @transform_4, window_bounds = array<i64: 32, 1>}, {pipeline_mode = #tpu.pipeline_mode<synchronous>, transform_indices = @transform_5, window_bounds = array<i64: 1, 32>}, {transform_indices = @transform_6, window_bounds = array<i64: 1, 1>}, {transform_indices = @transform_7, window_bounds = array<i64: 1, 8>}]} {
    %c0 = arith.constant 0 : index
    %c0_0 = arith.constant 0 : index
    %0 = vector.load %arg1[%c0, %c0_0] : memref<8x4xf32, #tpu.memory_space<vmem>>, vector<8x4xf32>
    %c0_1 = arith.constant 0 : index
    %c0_2 = arith.constant 0 : index
    %1 = vector.load %arg2[%c0_1, %c0_2] : memref<64x4xf32, #tpu.memory_space<vmem>>, vector<64x4xf32>
    %cst = arith.constant dense<0.000000e+00> : vector<64x8xf32>
    %2 = tpu.matmul %1, %0, %cst {dimension_numbers = #tpu.dot_dimension_numbers<[1], [1], [0], [0], [0, 0, 1, 0], [], []>} : vector<64x4xf32>, vector<8x4xf32>, vector<64x8xf32> -> vector<64x8xf32>
    %c0_3 = arith.constant 0 : index
    %c0_4 = arith.constant 0 : index
    %3 = vector.load %arg3[%c0_3, %c0_4] : memref<64x1xf32, #tpu.memory_space<vmem>>, vector<64x1xf32>
    %4 = vector.broadcast %3 : vector<64x1xf32> to vector<64x8xf32>
    %5 = arith.addf %2, %4 : vector<64x8xf32>
    %cst_5 = arith.constant 0.000000e+00 : f32
    %6 = vector.broadcast %cst_5 : f32 to vector<64x8xf32>
    %7 = arith.maximumf %5, %6 : vector<64x8xf32>
    %c0_6 = arith.constant 0 : index
    %c0_7 = arith.constant 0 : index
    %8 = vector.load %arg4[%c0_6, %c0_7] : memref<32x64xf32, #tpu.memory_space<vmem>>, vector<32x64xf32>
    %cst_8 = arith.constant dense<0.000000e+00> : vector<32x8xf32>
    %9 = tpu.matmul %8, %7, %cst_8 {dimension_numbers = #tpu.dot_dimension_numbers<[1], [0], [0], [1], [0, 0, 1, 1], [], []>} : vector<32x64xf32>, vector<64x8xf32>, vector<32x8xf32> -> vector<32x8xf32>
    %c0_9 = arith.constant 0 : index
    %c0_10 = arith.constant 0 : index
    %10 = vector.load %arg5[%c0_9, %c0_10] : memref<32x1xf32, #tpu.memory_space<vmem>>, vector<32x1xf32>
    %11 = vector.broadcast %10 : vector<32x1xf32> to vector<32x8xf32>
    %12 = arith.addf %9, %11 : vector<32x8xf32>
    %cst_11 = arith.constant 0.000000e+00 : f32
    %13 = vector.broadcast %cst_11 : f32 to vector<32x8xf32>
    %14 = arith.maximumf %12, %13 : vector<32x8xf32>
    %c0_12 = arith.constant 0 : index
    %c0_13 = arith.constant 0 : index
    %15 = vector.load %arg6[%c0_12, %c0_13] : memref<1x32xf32, #tpu.memory_space<vmem>>, vector<1x32xf32>
    %cst_14 = arith.constant dense<0.000000e+00> : vector<1x8xf32>
    %16 = tpu.matmul %15, %14, %cst_14 {dimension_numbers = #tpu.dot_dimension_numbers<[1], [0], [0], [1], [0, 0, 1, 1], [], []>} : vector<1x32xf32>, vector<32x8xf32>, vector<1x8xf32> -> vector<1x8xf32>
    %c0_15 = arith.constant 0 : index
    %c0_16 = arith.constant 0 : index
    %17 = memref.load %arg7[%c0_15, %c0_16] : memref<1x1xf32, #tpu.memory_space<smem>>
    %18 = vector.broadcast %17 : f32 to vector<1x8xf32>
    %19 = arith.addf %16, %18 : vector<1x8xf32>
    %cst_17 = arith.constant 5.000000e-01 : f32
    %20 = vector.broadcast %cst_17 : f32 to vector<1x8xf32>
    %21 = arith.mulf %20, %19 : vector<1x8xf32>
    %22 = math.tanh %21 : vector<1x8xf32>
    %cst_18 = arith.constant 1.000000e+00 : f32
    %23 = vector.broadcast %cst_18 : f32 to vector<1x8xf32>
    %24 = arith.addf %22, %23 : vector<1x8xf32>
    %cst_19 = arith.constant 5.000000e-01 : f32
    %25 = vector.broadcast %cst_19 : f32 to vector<1x8xf32>
    %26 = arith.mulf %25, %24 : vector<1x8xf32>
    %c0_20 = arith.constant 0 : index
    %c0_21 = arith.constant 0 : index
    %27 = vector.load %arg8[%c0_20, %c0_21] : memref<1x8xf32, #tpu.memory_space<vmem>>, vector<1x8xf32>
    tpu.vector_store %arg8[%c0_20, %c0_21], %26 {strides = array<i32>} : memref<1x8xf32, #tpu.memory_space<vmem>>, vector<1x8xf32>,
    return
  }
  func.func @transform_0(%arg0: i32) -> (i32, i32) {
    %c0_i32 = arith.constant 0 : i32
    %c0_i32_0 = arith.constant 0 : i32
    return %arg0, %c0_i32 : i32, i32
  }
  func.func @transform_1(%arg0: i32) -> (i32, i32) {
    %c0_i32 = arith.constant 0 : i32
    %c0_i32_0 = arith.constant 0 : i32
    %c0_i32_1 = arith.constant 0 : i32
    return %c0_i32, %c0_i32_0 : i32, i32
  }
  func.func @transform_2(%arg0: i32) -> (i32, i32) {
    %c0_i32 = arith.constant 0 : i32
    %c0_i32_0 = arith.constant 0 : i32
    %c0_i32_1 = arith.constant 0 : i32
    return %c0_i32, %c0_i32_0 : i32, i32
  }
  func.func @transform_3(%arg0: i32) -> (i32, i32) {
    %c0_i32 = arith.constant 0 : i32
    %c0_i32_0 = arith.constant 0 : i32
    %c0_i32_1 = arith.constant 0 : i32
    return %c0_i32, %c0_i32_0 : i32, i32
  }
  func.func @transform_4(%arg0: i32) -> (i32, i32) {
    %c0_i32 = arith.constant 0 : i32
    %c0_i32_0 = arith.constant 0 : i32
    %c0_i32_1 = arith.constant 0 : i32
    return %c0_i32, %c0_i32_0 : i32, i32
  }
  func.func @transform_5(%arg0: i32) -> (i32, i32) {
    %c0_i32 = arith.constant 0 : i32
    %c0_i32_0 = arith.constant 0 : i32
    %c0_i32_1 = arith.constant 0 : i32
    return %c0_i32, %c0_i32_0 : i32, i32
  }
  func.func @transform_6(%arg0: i32) -> (i32, i32) {
    %c0_i32 = arith.constant 0 : i32
    %c0_i32_0 = arith.constant 0 : i32
    %c0_i32_1 = arith.constant 0 : i32
    return %c0_i32, %c0_i32_0 : i32, i32
  }
  func.func @transform_7(%arg0: i32) -> (i32, i32) {
    %c0_i32 = arith.constant 0 : i32
    %c0_i32_0 = arith.constant 0 : i32
    return %c0_i32, %arg0 : i32, i32
  }
}

</mosaic_0001>

<bundles_post_ra>
// kernel: tpu_custom_call.1
= control target key start
LH: loop header
LB: loop body
LE: loop exit
PB: predicated region body
PF: predicated region fallthrough
CT: control target
= control target key end

     0   :  { %vm85_vm0 = vcmask 31744   ;;  %v595_v3 = vmov 0   ;;  %s747_s0 = inlined_call_operand.vmem [shape: f32[8,4], index: 0, kind: input, shape index: {}]   ;;  %s748_s1 = inlined_call_operand.vmem [shape: f32[64,4], index: 1, kind: input, shape index: {}]   ;;  %s749_s2 = inlined_call_operand.vmem [shape: f32[64,1], index: 2, kind: input, shape index: {}]   ;;  %s750_s3 = inlined_call_operand.vmem [shape: f32[32,64], index: 3, kind: input, shape index: {}]   ;;  %s751_s4 = inlined_call_operand.vmem [shape: f32[32,1], index: 4, kind: input, shape index: {}]   ;;  %s752_s5 = inlined_call_operand.vmem [shape: f32[1,32], index: 5, kind: input, shape index: {}]   ;;  %s753_s6 = inlined_call_operand.<no memory space> [shape: f32[1,1], index: 6, kind: input, shape index: {}]   ;;  %s754_s7 = inlined_call_operand.hbm [shape: f32[1,8], index: 7, kind: output, shape index: {}]  }
   0x1   :  { %v28_v0 = vld [vmem:[%s747_s0] sm:$0xff]  ;;  %v30_v2 = vld [vmem:[%s748_s1 + $0x8] sm:$0xff]  ;;  %567 = vset.pattern.permute.xlu0 %v595_v3  ;;  %v31_v4 = vld [vmem:[%s748_s1 + $0x10] sm:$0xff]  ;;  %568 = vset.pattern.permute.xlu1 %v595_v3 }
   0x2   :  { %v29_v1 = vld [vmem:[%s748_s1] sm:$0xff]  ;;  %493 = vmatprep.subr.msk.mxu0 %vm85_vm0, %v28_v0  ;;  %v39_v6 = vld [vmem:[%s749_s2 + $0x10] sm:$0xff]  ;;  %v38_v7 = vld [vmem:[%s749_s2 + $0x8] sm:$0xff] }
   0x3   :  { %495 = vmatprep.mubr.msk.f32.mxu0 %vm85_vm0, %v29_v1  ;;  %494 = vmatpush3.xpose.msk.msra.mxu0 %vm85_vm0, %v28_v0  ;;  %v37_v5 = vld [vmem:[%s749_s2] sm:$0xff]  ;;  %v40_v8 = vld [vmem:[%s749_s2 + $0x18] sm:$0xff] }
   0x4   :  { %47 = vperm.xlu0 %567, %v37_v5   ;;  %57 = vperm.xlu1 %568, %v39_v6   ;;  %v32_v9 = vld [vmem:[%s748_s1 + $0x18] sm:$0xff]  ;;  %v33_v10 = vld [vmem:[%s748_s1 + $0x20] sm:$0xff] }
   0x6   :  { %496 = vmatmul.mubr.msk.f32.vlgmr.msra.gmra.mrb[0].mxu0 %vm85_vm0, %v30_v2 }
   0x7   :  { %498 = vmatprep.mubr.msk.f32.mxu0 %vm85_vm0, %v31_v4 }
   0x8   :  { %13 = vsyncpa [#allocation4], 0  ;;  %52 = vperm.xlu0 %567, %v38_v7   ;;  %62 = vperm.xlu1 %568, %v40_v8   ;;  %v41_v11 = vld [vmem:[%s749_s2 + $0x20] sm:$0xff]  ;;  %v42_v12 = vld [vmem:[%s749_s2 + $0x28] sm:$0xff]  ;;  %vm254_vm1 = vcmask 523264   ;;  %v596_v62 = vmov 0.0|0.0  }
   0x9   :  { %v34_v13 = vld [vmem:[%s748_s1 + $0x28] sm:$0xff]  ;;  %v35_v14 = vld [vmem:[%s748_s1 + $0x30] sm:$0xff]  ;;  %v44_v16 = vld [vmem:[%s749_s2 + $0x38] sm:$0xff]  ;;  %556 = vmatprep.subr.bf16.mxu0 %v596_v62  ;;  %vm597_vm2 = vmmov 0   ;;  %v598_v63 = vmov 0.0   ;;  %vm359_vm3 = vcmask 261120  }
   0xa   :  { %499 = vmatmul.mubr.msk.f32.gmra.mrb[2].mxu0 %vm85_vm0, %v32_v9  ;;  %v43_v15 = vld [vmem:[%s749_s2 + $0x30] sm:$0xff]  ;;  %v36_v17 = vld [vmem:[%s748_s1 + $0x38] sm:$0xff]  ;;  %v230_v18 = vld [vmem:[%s751_s4] sm:$0xff]  ;;  %s599_s26 = smov [#allocation3]   ;;  %vm437_vm4 = vcmask 57344  }
   0xb   :  { %501 = vmatprep.mubr.msk.f32.mxu0 %vm85_vm0, %v33_v10  ;;  %v231_v19 = vld [vmem:[%s751_s4 + $0x8] sm:$0xff]  ;;  %v232_v20 = vld [vmem:[%s751_s4 + $0x10] sm:$0xff]  ;;  %v233_v21 = vld [vmem:[%s751_s4 + $0x18] sm:$0xff]  ;;  %s445_s27 = sshll.u32 %s599_s26, 4  ;;  %s446_s27 = int_to_ptr.vmem [resolvable:$true] %s445_s27 }
   0xc   :  { %67 = vperm.xlu0 %567, %v41_v11   ;;  %72 = vperm.xlu1 %568, %v42_v12   ;;  %v226_v22 = vld [vmem:[%s750_s3] sm:$0xff]  ;;  %v227_v59 = vld [vmem:[%s750_s3 + $0x8] sm:$0xff]  ;;  %v228_v60 = vld [vmem:[%s750_s3 + $0x10] sm:$0xff]  ;;  %s575_s28 = scalar_lea.vmem %s446_s27, 32  ;;  %p576_p1 = scmp.lt.s32.totalorder %s446_s27, %s446_s27 }
   0xd   :  { %523 = vmatprep.mubr.msk.f32.mxu1 %vm254_vm1, %v226_v22  ;;  %v229_v61 = vld [vmem:[%s750_s3 + $0x18] sm:$0xff] }
   0xe   :  { %502 = vmatmul.mubr.msk.f32.gmra.mrb[4].mxu0 %vm85_vm0, %v34_v13 }
   0xf   :  { %504 = vmatprep.mubr.msk.f32.mxu0 %vm85_vm0, %v35_v14 }
  0x10   :  { %77 = vperm.xlu0 %567, %v43_v15   ;;  %82 = vperm.xlu1 %568, %v44_v16  }
  0x12   :  { %505 = vmatmul.mubr.msk.f32.gmra.mrb[6].mxu0 %vm85_vm0, %v36_v17 }
  0x13   :  { %537 = vmatprep.mubr.msk.f32.mxu0 %vm597_vm2, %v598_v63 }
  0x14   :  { %236 = vperm.xlu0 %567, %v230_v18   ;;  %241 = vperm.xlu1 %568, %v231_v19   ;;  %v356_v18 = vld [vmem:[%s752_s5] sm:$0x1]  ;;  %v358_v19 = vstv %s753_s6  ;;  %s571_s5 = scalar_lea.vmem %s446_s27, 16 }
  0x15   :  { %p572_p0 = scmp.ne.s32.totalorder %s446_s27, %s571_s5  ;;  %p577_p2 = scmp.lt.s32.totalorder %s575_s28, %s571_s5 }
  0x17   :  { %p578_p3 = por %p577_p2, %p576_p1 }
  0x18   :  { %246 = vperm.xlu0 %567, %v232_v20   ;;  %251 = vperm.xlu1 %568, %v233_v21  }
  0x19   :  { %p579_p4 = pnand %p578_p3, %p572_p0 }
  0x83   :  { %v48_v23 = vpop.permute.xlu0 %47  ;;  %v58_v24 = vpop.permute.xlu1 %57 }
  0x87   :  { %v53_v25 = vpop.permute.xlu0 %52  ;;  %v63_v26 = vpop.permute.xlu1 %62 }
  0x8b   :  { %v73_v36 = vpop.permute.xlu1 %72  ;;  %v68_v39 = vpop.permute.xlu0 %67 }
  0x8f   :  { %v83_v48 = vpop.permute.xlu1 %82  ;;  %v78_v51 = vpop.permute.xlu0 %77 }
  0x93   :  { %v242_v0 = vpop.permute.xlu1 %241  ;;  %v237_v1 = vpop.permute.xlu0 %236 }
  0x97   :  { %v252_v7 = vpop.permute.xlu1 %251  ;;  %v247_v10 = vpop.permute.xlu0 %246 }
  0xd9   :  { %v497_v27 = vpop.f32.mrb[0].mxu0 }
  0xda   :  { %v185_v28 = vadd.f32 %v497_v27, %v53_v25  ;;  %v179_v29 = vpop.f32.mrb[1].mxu0 }
  0xdb   :  { %v180_v30 = vadd.f32 %v179_v29, %v48_v23 }
  0xdc   :  { %v219_v31 = vmax.f32 %v185_v28, 0.0 }
  0xdd   :  { %v218_v32 = vmax.f32 %v180_v30, 0.0  ;;  %v500_v33 = vpop.f32.mrb[2].mxu0 }
  0xde   :  { %v195_v34 = vadd.f32 %v500_v33, %v63_v26  ;;  %v189_v35 = vpop.f32.mrb[3].mxu0 }
  0xdf   :  { %v190_v37 = vadd.f32 %v189_v35, %v58_v24  ;;  %v540_v38 = vpack.c.bf16 %v219_v31, %v218_v32 }
  0xe0   :  { %v221_v40 = vmax.f32 %v195_v34, 0.0 }
  0xe1   :  { %v220_v41 = vmax.f32 %v190_v37, 0.0  ;;  %v503_v42 = vpop.f32.mrb[4].mxu0  ;;  %541 = vmatprep.subr.bf16.mxu1 %v540_v38 }
  0xe2   :  { %v205_v43 = vadd.f32 %v503_v42, %v73_v36  ;;  %v199_v44 = vpop.f32.mrb[5].mxu0  ;;  %543 = vmatpush3.bf16.msra.mxu1 %v540_v38 }
  0xe3   :  { %v544_v45 = vpack.c.bf16 %v221_v40, %v220_v41  ;;  %v200_v46 = vadd.f32 %v199_v44, %v68_v39 }
  0xe4   :  { %v223_v47 = vmax.f32 %v205_v43, 0.0 }
  0xe5   :  { %v222_v49 = vmax.f32 %v200_v46, 0.0  ;;  %v506_v50 = vpop.f32.mrb[6].mxu0  ;;  %545 = vmatprep.subr.bf16.mxu1 %v544_v45 }
  0xe6   :  { %v215_v52 = vadd.f32 %v506_v50, %v83_v48  ;;  %v209_v53 = vpop.f32.mrb[7].mxu0  ;;  %547 = vmatpush3.bf16.msra.mxu1 %v544_v45 }
  0xe7   :  { %v548_v54 = vpack.c.bf16 %v223_v47, %v222_v49  ;;  %v210_v55 = vadd.f32 %v209_v53, %v78_v51 }
  0xe8   :  { %v225_v56 = vmax.f32 %v215_v52, 0.0 }
  0xe9   :  { %v224_v57 = vmax.f32 %v210_v55, 0.0  ;;  %549 = vmatprep.subr.bf16.mxu1 %v548_v54 }
  0xea   :  { %551 = vmatpush3.bf16.msra.mxu1 %v548_v54 }
  0xeb   :  { %v552_v58 = vpack.c.bf16 %v225_v56, %v224_v57 }
  0xed   :  { %553 = vmatprep.subr.bf16.mxu1 %v552_v58 }
  0xee   :  { %555 = vmatpush3.bf16.msra.mxu1 %v552_v58 }
  0xf1   :  { %524 = vmatmul.mubr.msk.f32.vlgmr.msra.gmra.mrb[0].mxu1 %vm254_vm1, %v227_v59 }
  0xf2   :  { %526 = vmatprep.mubr.msk.f32.mxu1 %vm254_vm1, %v228_v60 }
  0xf5   :  { %527 = vmatmul.mubr.msk.f32.gmra.mrb[2].mxu1 %vm254_vm1, %v229_v61 }
 0x1c4   :  { %v525_v2 = vpop.f32.mrb[0].mxu1 }
 0x1c5   :  { %v339_v3 = vadd.f32 %v525_v2, %v242_v0  ;;  %v333_v4 = vpop.f32.mrb[1].mxu1 }
 0x1c6   :  { %v334_v5 = vadd.f32 %v333_v4, %v237_v1 }
 0x1c7   :  { %v353_v6 = vmax.f32 %v339_v3, 0.0 }
 0x1c8   :  { %v352_v8 = vmax.f32 %v334_v5, 0.0  ;;  %v528_v9 = vpop.f32.mrb[2].mxu1 }
 0x1c9   :  { %v349_v11 = vadd.f32 %v528_v9, %v252_v7  ;;  %v343_v12 = vpop.f32.mrb[3].mxu1 }
 0x1ca   :  { %v557_v13 = vpack.c.bf16 %v353_v6, %v352_v8  ;;  %v344_v14 = vadd.f32 %v343_v12, %v247_v10 }
 0x1cb   :  { %v355_v15 = vmax.f32 %v349_v11, 0.0 }
 0x1cc   :  { %v354_v16 = vmax.f32 %v344_v14, 0.0  ;;  %558 = vmatpush3.bf16.msra.mxu0 %v557_v13 }
 0x1cd   :  { %559 = vmatprep.subr.bf16.mxu0 %v596_v62 }
 0x1ce   :  { %v560_v17 = vpack.c.bf16 %v355_v15, %v354_v16 }
 0x1d0   :  { %561 = vmatpush3.bf16.msra.mxu0 %v560_v17 }
 0x1d3   :  { %538 = vmatmul.mubr.msk.f32.vlgmr.msra.gmra.mrb[8].mxu0 %vm359_vm3, %v356_v18 }
 0x2a6   :  { %v429_v20 = vpop.f32.mrb[8].mxu0 }
 0x2a7   :  { %v430_v21 = vadd.f32 %v429_v20, %v358_v19  ;;  %v539_v22 = vpop.f32.mrb[9].mxu0 }
 0x2a9   :  { %v433_v23 = vmul.f32 0.5, %v430_v21 }
 0x2ab   :  { %569 = vtanh.f32 %v433_v23 }
 0x2b5   :  { %v570_v24 = vpop.eup %569 }
 0x2b6   :  { %v435_v25 = vadd.f32 1.0, %v570_v24 }
 0x2b8   :  { %v436_v26 = vmul.f32 0.5, %v435_v25 }
 0x2ba   :  { %438 = vst.msk [vmem:[#allocation3] sm:$0x1] %vm437_vm4, %v436_v26 }
 0x2bb   :  { %582 = shalt.err (!%p579_p4)
}
 0x2bc   :  { %s583_s30 = scalar_lea.hbm %s754_s7, 16 }
 0x2bd   :  { %p584_p5 = scmp.ne.s32.totalorder %s754_s7, %s583_s30  ;;  %p587_p6 = scmp.lt.u32.totalorder %s583_s30, %s754_s7 }
 0x2bf   :  { %p589_p7 = pnand %p587_p6, %p584_p5 }
 0x2c1   :  { %592 = shalt.err (!%p589_p7)
}
 0x2c2   :  { %448 = dma.vmem_to_hbm [thread:$0]  %s446_s27, 16, %s754_s7, [#allocation4]  }
 0x2c3   :  { %593 = dma.done.wait [#allocation4], 16  }
 0x2c4   :  { %594 = vsyncadd [#allocation4], 4294967280 }
 0x2c5   :  { %452 = vsyncpa [#allocation4], 1 }

</bundles_post_ra>
